<compile_context>
chip_gen: v7x
topology: tpu7x:2x2x1
jax: 0.10.0
libtpu: 0.0.40
codegen_flags: <defaults>
</compile_context>

<pallas_src>
import math

import jax
import jax.numpy as jnp
from jax.experimental import pallas as pl
from jax.experimental.pallas import tpu as pltpu


def _round_up(a: int, b: int) -> int:
    return (a + b - 1) // b * b


def _fc_kernel(x_ref, w1_ref, b1_ref, w2_ref, b2_ref, o_ref):
    # x_ref:  (TM, in_dim)      bf16
    # w1_ref: (in_dim, dim_ff)  bf16     b1_ref: (1, dim_ff)  f32
    # w2_ref: (dim_ff, out_pad) bf16     b2_ref: (1, out_pad) f32
    # o_ref:  (TM, out_pad)     f32
    h = jnp.dot(x_ref[...], w1_ref[...], preferred_element_type=jnp.float32)
    h = jnp.maximum(h + b1_ref[...], 0.0)            # Linear1 bias + ReLU in f32 (Dropout = id)
    y = jnp.dot(h.astype(w2_ref.dtype), w2_ref[...],
                preferred_element_type=jnp.float32)
    y = jnp.maximum(y + b2_ref[...], 0.0)            # Linear2 bias + ReLU in f32 (Dropout = id)
    o_ref[...] = y.astype(o_ref.dtype)


def fc_forward(x, params, *, tile_m: int = 512):
    """x: (..., in_dim) float32.  Returns (..., out_dim), matching PyTorch FC.forward (eval)."""
    w1 = params["w1"]          # (dim_ff, in_dim)   -- PyTorch nn.Linear layout
    b1 = params["b1"]          # (dim_ff,)
    w2 = params["w2"]          # (out_dim, dim_ff)
    b2 = params["b2"]          # (out_dim,)

    in_dim = x.shape[-1]
    dim_ff = w1.shape[0]
    out_dim = w2.shape[0]
    out_pad = _round_up(out_dim, 128)                # lane-dense output width

    lead_shape = x.shape[:-1]
    M = int(math.prod(lead_shape)) if lead_shape else 1

    # ---- glue: flatten all leading dims into one big M (rows) dimension ----
    x2d = x.reshape(M, in_dim).astype(jnp.float32)

    # Row tile selection (multiples of 16 for bf16 sublane packing).
    m_pad = _round_up(max(M, 16), 16)
    if m_pad <= tile_m:
        if m_pad > 128:
            # Force >= 2 grid steps so the "parallel" axis shards across v7x's 2 TCs.
            tm = _round_up((m_pad + 1) // 2, 16)
            m_pad = 2 * tm
        else:
            tm = m_pad
    else:
        tm = tile_m
        m_pad = _round_up(M, tm)
    if m_pad != M:
        x2d = jnp.pad(x2d, ((0, m_pad - M), (0, 0)))
    grid_m = m_pad // tm

    # Weights pre-transposed to (in, out), cast to bf16; W2/b2 zero-padded to out_pad lanes.
    x_bf = x2d.astype(jnp.bfloat16)
    w1_t = jnp.transpose(w1).astype(jnp.bfloat16)                            # (in_dim, dim_ff)
    w2_t = jnp.pad(jnp.transpose(w2).astype(jnp.float32),
                   ((0, 0), (0, out_pad - out_dim))).astype(jnp.bfloat16)    # (dim_ff, out_pad)
    b1_r = b1.reshape(1, dim_ff).astype(jnp.float32)
    b2_r = jnp.pad(b2.reshape(1, out_dim).astype(jnp.float32),
                   ((0, 0), (0, out_pad - out_dim)))                         # (1, out_pad)

    # Cost estimate (bf16 inputs/weights, f32 padded output).
    flops = 2 * m_pad * (in_dim * dim_ff + dim_ff * out_pad)
    bytes_accessed = (2 * m_pad * in_dim + 2 * in_dim * dim_ff + 4 * dim_ff
                      + 2 * dim_ff * out_pad + 4 * out_pad + 4 * m_pad * out_pad)

    # Explicit VMEM budget (double-buffered x/out tiles, resident weights, f32 intermediate).
    vmem_need = (2 * tm * in_dim * 2            # x tile (bf16), double-buffered
                 + 2 * in_dim * dim_ff * 2      # W1 (bf16)
                 + 2 * dim_ff * 4               # b1 (f32)
                 + 2 * dim_ff * out_pad * 2     # W2 (bf16, padded)
                 + 2 * out_pad * 4              # b2 (f32)
                 + 2 * tm * out_pad * 4         # out tile (f32), double-buffered
                 + tm * dim_ff * 4)             # f32 intermediate h
    vmem_limit = min(max(int(vmem_need * 1.25) + (1 << 20), 32 << 20), 64 << 20)

    out2d = pl.pallas_call(
        _fc_kernel,
        out_shape=jax.ShapeDtypeStruct((m_pad, out_pad), jnp.float32),
        grid=(grid_m,),
        in_specs=[
            pl.BlockSpec((tm, in_dim), lambda i: (i, 0)),        # x rows
            pl.BlockSpec((in_dim, dim_ff), lambda i: (0, 0)),    # W1 (resident)
            pl.BlockSpec((1, dim_ff), lambda i: (0, 0)),         # b1 (resident)
            pl.BlockSpec((dim_ff, out_pad), lambda i: (0, 0)),   # W2 (resident, lane-padded)
            pl.BlockSpec((1, out_pad), lambda i: (0, 0)),        # b2 (resident, lane-padded)
        ],
        out_specs=pl.BlockSpec((tm, out_pad), lambda i: (i, 0)),
        compiler_params=pltpu.CompilerParams(
            dimension_semantics=("parallel",),
            vmem_limit_bytes=vmem_limit),
        cost_estimate=pl.CostEstimate(flops=flops, transcendentals=0,
                                      bytes_accessed=bytes_accessed),
    )(x_bf, w1_t, b1_r, w2_t, b2_r)

    out = out2d[:M, :out_dim]                                    # drop row + lane padding
    return out.reshape(*lead_shape, out_dim)


def _reference_forward(x, params):
    """Pure-JAX f32 reference (eval-mode FC)."""
    h = jnp.maximum(x @ params["w1"].T + params["b1"], 0.0)
    y = jnp.maximum(h @ params["w2"].T + params["b2"], 0.0)
    return y


if __name__ == "__main__":
    # Module hyperparameters (scaled-down but structurally identical to FC defaults).
    in_dim, dim_feedforward, out_dim = 128, 256, 7
    batch, seq = 2, 8                      # x: (batch, seq, in_dim)

    key = jax.random.PRNGKey(0)
    kx, kw1, kb1, kw2, kb2 = jax.random.split(key, 5)

    x = jax.random.normal(kx, (batch, seq, in_dim), dtype=jnp.float32)
    params = {
        "w1": (1.0 / math.sqrt(in_dim)) *
              jax.random.normal(kw1, (dim_feedforward, in_dim), jnp.float32),
        "b1": 0.1 * jax.random.normal(kb1, (dim_feedforward,), jnp.float32),
        "w2": (1.0 / math.sqrt(dim_feedforward)) *
              jax.random.normal(kw2, (out_dim, dim_feedforward), jnp.float32),
        "b2": 0.1 * jax.random.normal(kb2, (out_dim,), jnp.float32),
    }

    out = fc_forward(x, params)
    out = jax.block_until_ready(out)

    ref = _reference_forward(x, params)
    assert out.shape == ref.shape, (out.shape, ref.shape)
    # bf16 matmul inputs with f32 accumulation -> loosened tolerance vs. the f32 reference.
    assert jnp.allclose(out, ref, atol=5e-2, rtol=5e-2), float(jnp.max(jnp.abs(out - ref)))

    print("KERNEL_OK")
</pallas_src>

<mosaic_0001>
module attributes {stable_mosaic.version = 11 : i64} {
  func.func @_fc_kernel(%arg0: i32, %arg1: memref<16x128xbf16, #tpu.memory_space<vmem>>, %arg2: memref<128x256xbf16, #tpu.memory_space<vmem>>, %arg3: memref<1x256xf32, #tpu.memory_space<vmem>>, %arg4: memref<256x128xbf16, #tpu.memory_space<vmem>>, %arg5: memref<1x128xf32, #tpu.memory_space<vmem>>, %arg6: memref<16x128xf32, #tpu.memory_space<vmem>>) attributes {dimension_semantics = [#tpu.dimension_semantics<parallel>], iteration_bounds = array<i64: 1>, scalar_prefetch = 0 : i64, scratch_operands = 0 : i64, tpu.core_type = #tpu.core_type<tc>, window_params = [{transform_indices = @transform_0, window_bounds = array<i64: 16, 128>}, {pipeline_mode = #tpu.pipeline_mode<synchronous>, transform_indices = @transform_1, window_bounds = array<i64: 128, 256>}, {pipeline_mode = #tpu.pipeline_mode<synchronous>, transform_indices = @transform_2, window_bounds = array<i64: 1, 256>}, {pipeline_mode = #tpu.pipeline_mode<synchronous>, transform_indices = @transform_3, window_bounds = array<i64: 256, 128>}, {pipeline_mode = #tpu.pipeline_mode<synchronous>, transform_indices = @transform_4, window_bounds = array<i64: 1, 128>}, {transform_indices = @transform_5, window_bounds = array<i64: 16, 128>}]} {
    %c0 = arith.constant 0 : index
    %c0_0 = arith.constant 0 : index
    %0 = vector.load %arg1[%c0, %c0_0] : memref<16x128xbf16, #tpu.memory_space<vmem>>, vector<16x128xbf16>
    %c0_1 = arith.constant 0 : index
    %c0_2 = arith.constant 0 : index
    %1 = vector.load %arg2[%c0_1, %c0_2] : memref<128x256xbf16, #tpu.memory_space<vmem>>, vector<128x256xbf16>
    %cst = arith.constant dense<0.000000e+00> : vector<16x256xf32>
    %2 = tpu.matmul %0, %1, %cst {dimension_numbers = #tpu.dot_dimension_numbers<[1], [0], [0], [1], [0, 0, 1, 1], [], []>} : vector<16x128xbf16>, vector<128x256xbf16>, vector<16x256xf32> -> vector<16x256xf32>
    %c0_3 = arith.constant 0 : index
    %c0_4 = arith.constant 0 : index
    %3 = vector.load %arg3[%c0_3, %c0_4] : memref<1x256xf32, #tpu.memory_space<vmem>>, vector<1x256xf32>
    %4 = vector.broadcast %3 : vector<1x256xf32> to vector<16x256xf32>
    %5 = arith.addf %2, %4 : vector<16x256xf32>
    %cst_5 = arith.constant 0.000000e+00 : f32
    %6 = vector.broadcast %cst_5 : f32 to vector<16x256xf32>
    %7 = arith.maximumf %5, %6 : vector<16x256xf32>
    %8 = arith.truncf %7 : vector<16x256xf32> to vector<16x256xbf16>
    %c0_6 = arith.constant 0 : index
    %c0_7 = arith.constant 0 : index
    %9 = vector.load %arg4[%c0_6, %c0_7] : memref<256x128xbf16, #tpu.memory_space<vmem>>, vector<256x128xbf16>
    %cst_8 = arith.constant dense<0.000000e+00> : vector<16x128xf32>
    %10 = tpu.matmul %8, %9, %cst_8 {dimension_numbers = #tpu.dot_dimension_numbers<[1], [0], [0], [1], [0, 0, 1, 1], [], []>} : vector<16x256xbf16>, vector<256x128xbf16>, vector<16x128xf32> -> vector<16x128xf32>
    %c0_9 = arith.constant 0 : index
    %c0_10 = arith.constant 0 : index
    %11 = vector.load %arg5[%c0_9, %c0_10] : memref<1x128xf32, #tpu.memory_space<vmem>>, vector<1x128xf32>
    %12 = vector.broadcast %11 : vector<1x128xf32> to vector<16x128xf32>
    %13 = arith.addf %10, %12 : vector<16x128xf32>
    %cst_11 = arith.constant 0.000000e+00 : f32
    %14 = vector.broadcast %cst_11 : f32 to vector<16x128xf32>
    %15 = arith.maximumf %13, %14 : vector<16x128xf32>
    %c0_12 = arith.constant 0 : index
    %c0_13 = arith.constant 0 : index
    %16 = vector.load %arg6[%c0_12, %c0_13] : memref<16x128xf32, #tpu.memory_space<vmem>>, vector<16x128xf32>
    tpu.vector_store %arg6[%c0_12, %c0_13], %15 {strides = array<i32>} : memref<16x128xf32, #tpu.memory_space<vmem>>, vector<16x128xf32>,
    return
  }
  func.func @transform_0(%arg0: i32) -> (i32, i32) {
    %c0_i32 = arith.constant 0 : i32
    %c0_i32_0 = arith.constant 0 : i32
    return %arg0, %c0_i32 : i32, i32
  }
  func.func @transform_1(%arg0: i32) -> (i32, i32) {
    %c0_i32 = arith.constant 0 : i32
    %c0_i32_0 = arith.constant 0 : i32
    %c0_i32_1 = arith.constant 0 : i32
    return %c0_i32, %c0_i32_0 : i32, i32
  }
  func.func @transform_2(%arg0: i32) -> (i32, i32) {
    %c0_i32 = arith.constant 0 : i32
    %c0_i32_0 = arith.constant 0 : i32
    %c0_i32_1 = arith.constant 0 : i32
    return %c0_i32, %c0_i32_0 : i32, i32
  }
  func.func @transform_3(%arg0: i32) -> (i32, i32) {
    %c0_i32 = arith.constant 0 : i32
    %c0_i32_0 = arith.constant 0 : i32
    %c0_i32_1 = arith.constant 0 : i32
    return %c0_i32, %c0_i32_0 : i32, i32
  }
  func.func @transform_4(%arg0: i32) -> (i32, i32) {
    %c0_i32 = arith.constant 0 : i32
    %c0_i32_0 = arith.constant 0 : i32
    %c0_i32_1 = arith.constant 0 : i32
    return %c0_i32, %c0_i32_0 : i32, i32
  }
  func.func @transform_5(%arg0: i32) -> (i32, i32) {
    %c0_i32 = arith.constant 0 : i32
    %c0_i32_0 = arith.constant 0 : i32
    return %arg0, %c0_i32 : i32, i32
  }
}

</mosaic_0001>

<bundles_post_ra>
// kernel: tpu_custom_call.1
= control target key start
LH: loop header
LB: loop body
LE: loop exit
PB: predicated region body
PF: predicated region fallthrough
CT: control target
= control target key end

     0   :  { %10 = vsyncpa [#allocation3], 0  ;;  %s725_s0 = inlined_call_operand.hbm [shape: bf16[16,128], index: 0, kind: input, shape index: {}]   ;;  %s726_s1 = inlined_call_operand.hbm [shape: bf16[128,256], index: 1, kind: input, shape index: {}]   ;;  %s727_s2 = inlined_call_operand.vmem [shape: f32[1,256], index: 2, kind: input, shape index: {}]   ;;  %s728_s3 = inlined_call_operand.hbm [shape: bf16[256,128], index: 3, kind: input, shape index: {}]   ;;  %s729_s4 = inlined_call_operand.vmem [shape: f32[1,128], index: 4, kind: input, shape index: {}]   ;;  %s730_s5 = inlined_call_operand.hbm [shape: f32[16,128], index: 5, kind: output, shape index: {}]  }
   0x1   :  { %11 = vsyncpa [#allocation6], 0 }
   0x2   :  { %12 = vsyncpa [#allocation4], 0  ;;  %s626_s18 = smov [#allocation5]   ;;  %s532_s22 = scalar_lea.hbm %s726_s1, 2048 }
   0x3   :  { %s30_s19 = sshll.u32 %s626_s18, 4  ;;  %p533_p0 = scmp.ne.s32.totalorder %s726_s1, %s532_s22  ;;  %s31_s19 = int_to_ptr.vmem [resolvable:$true] %s30_s19 }
   0x4   :  { %p536_p1 = scmp.lt.u32.totalorder %s532_s22, %s726_s1 }
   0x6   :  { %p538_p2 = pnand %p536_p1, %p533_p0 }
   0x8   :  { %541 = shalt.err (!%p538_p2)
}
   0x9   :  { %s542_s27 = scalar_lea.vmem %s31_s19, 2048  ;;  %p547_p4 = scmp.lt.s32.totalorder %s31_s19, %s31_s19 }
   0xa   :  { %p543_p3 = scmp.ne.s32.totalorder %s31_s19, %s542_s27  ;;  %p548_p5 = scmp.lt.s32.totalorder %s542_s27, %s542_s27 }
   0xc   :  { %p549_p6 = por %p548_p5, %p547_p4 }
   0xe   :  { %p550_p7 = pnand %p549_p6, %p543_p3 }
  0x10   :  { %553 = shalt.err (!%p550_p7)
}
  0x11   :  { %s627_s28 = smov 128   ;;  %s628_s29 = smov 8  }
  0x12   :  { %36 = dma.hbm_to_vmem [thread:$0]  %s726_s1, 2048, %s31_s19, [#allocation6], %s627_s28, %s627_s28, %s628_s29  }
  0x13   :  { %s629_s7 = smov [#allocation2]   ;;  %s554_s11 = scalar_lea.hbm %s725_s0, 128 }
  0x14   :  { %s18_s8 = sshll.u32 %s629_s7, 4  ;;  %p555_p8 = scmp.ne.s32.totalorder %s725_s0, %s554_s11  ;;  %s19_s8 = int_to_ptr.vmem [resolvable:$true] %s18_s8 }
  0x15   :  { %p558_p9 = scmp.lt.u32.totalorder %s554_s11, %s725_s0 }
  0x17   :  { %p560_p10 = pnand %p558_p9, %p555_p8 }
  0x19   :  { %563 = shalt.err (!%p560_p10)
}
  0x1a   :  { %s564_s16 = scalar_lea.vmem %s19_s8, 128  ;;  %p569_p12 = scmp.lt.s32.totalorder %s19_s8, %s19_s8 }
  0x1b   :  { %p565_p11 = scmp.ne.s32.totalorder %s19_s8, %s564_s16  ;;  %p570_p13 = scmp.lt.s32.totalorder %s564_s16, %s564_s16 }
  0x1d   :  { %p571_p0 = por %p570_p13, %p569_p12 }
  0x1f   :  { %p572_p1 = pnand %p571_p0, %p565_p11 }
  0x21   :  { %575 = shalt.err (!%p572_p1)
}
  0x22   :  { %s630_s1 = smov 64   ;;  %s631_s17 = smov 4  }
  0x23   :  { %24 = dma.hbm_to_vmem [thread:$0]  %s725_s0, 128, %s19_s8, [#allocation3], %s630_s1, %s630_s1, %s631_s17  }
  0x24   :  { %s632_s20 = smov [#allocation7]   ;;  %s576_s24 = scalar_lea.hbm %s728_s3, 2048 }
  0x25   :  { %s44_s21 = sshll.u32 %s632_s20, 4  ;;  %p577_p2 = scmp.ne.s32.totalorder %s728_s3, %s576_s24  ;;  %s45_s21 = int_to_ptr.vmem [resolvable:$true] %s44_s21 }
  0x26   :  { %p580_p3 = scmp.lt.u32.totalorder %s576_s24, %s728_s3 }
  0x28   :  { %p582_p4 = pnand %p580_p3, %p577_p2 }
  0x2a   :  { %585 = shalt.err (!%p582_p4)
}
  0x2b   :  { %s586_s6 = scalar_lea.vmem %s45_s21, 2048  ;;  %p591_p6 = scmp.lt.s32.totalorder %s45_s21, %s45_s21 }
  0x2c   :  { %p587_p5 = scmp.ne.s32.totalorder %s45_s21, %s586_s6  ;;  %p592_p7 = scmp.lt.s32.totalorder %s586_s6, %s586_s6 }
  0x2e   :  { %p593_p8 = por %p592_p7, %p591_p6 }
  0x30   :  { %p594_p9 = pnand %p593_p8, %p587_p5 }
  0x32   :  { %597 = shalt.err (!%p594_p9)
}
  0x33   :  { %50 = dma.hbm_to_vmem [thread:$0]  %s728_s3, 2048, %s45_s21, [#allocation6], %s630_s1, %s630_s1, %s631_s17  }
  0x34   :  { %620 = dma.done.wait [#allocation3], 128  }
  0x35   :  { %621 = vsyncadd [#allocation3], 4294967168 }
  0x36   :  { %622 = dma.done.wait [#allocation6], 4096  }
  0x37   :  { %623 = vsyncadd [#allocation6], 4294963200  ;;  %v633_v0 = vmov 0   ;;  %v491_v1 = vld [vmem:[#allocation5 + $0x4] ss:$8 sps:$4 sm:$0xff]   ;;  %v520_v16 = vld [vmem:[#allocation7 + $0x50] sm:$0xff]   ;;  %v83_v34 = vlaneseq }
  0x38   :  { %211 = vmatprep.mubr.bf16.mxu0 %v633_v0  ;;  %v493_v2 = vld [vmem:[#allocation5] ss:$8 sps:$4 sm:$0xff]   ;;  %179 = vmatprep.subr.bf16.mxu0 %v491_v1  ;;  %v494_v3 = vld [vmem:[#allocation5 + $0x14] ss:$8 sps:$4 sm:$0xff]   ;;  %v496_v4 = vld [vmem:[#allocation5 + $0x10] ss:$8 sps:$4 sm:$0xff]  }
  0x39   :  { %180 = vmatpush1.bf16.msra.mxu0 %v493_v2  ;;  %v497_v5 = vld [vmem:[#allocation5 + $0x24] ss:$8 sps:$4 sm:$0xff]   ;;  %v499_v6 = vld [vmem:[#allocation5 + $0x20] ss:$8 sps:$4 sm:$0xff]   ;;  %v500_v7 = vld [vmem:[#allocation5 + $0x34] ss:$8 sps:$4 sm:$0xff]  }
  0x3a   :  { %181 = vmatprep.subr.bf16.mxu0 %v494_v3  ;;  %v502_v8 = vld [vmem:[#allocation5 + $0x30] ss:$8 sps:$4 sm:$0xff]   ;;  %v503_v9 = vld [vmem:[#allocation5 + $0x44] ss:$8 sps:$4 sm:$0xff]   ;;  %v505_v11 = vld [vmem:[#allocation5 + $0x40] ss:$8 sps:$4 sm:$0xff]  }
  0x3b   :  { %v516_v10 = vld [vmem:[#allocation7 + $0x40] sm:$0xff]   ;;  %v506_v13 = vld [vmem:[#allocation5 + $0x54] ss:$8 sps:$4 sm:$0xff]   ;;  %v518_v14 = vld [vmem:[#allocation7 + $0x48] sm:$0xff]   ;;  %v84_v35 = vshrl.u32 %v83_v34, 7  ;;  %s634_s10 = smov [#allocation8]  }
  0x3c   :  { %v517_v12 = vld [vmem:[#allocation7] sm:$0xff]   ;;  %460 = vmatprep.subr.bf16.mxu1 %v516_v10  ;;  %v519_v15 = vld [vmem:[#allocation7 + $0x8] sm:$0xff]   ;;  %v508_v17 = vld [vmem:[#allocation5 + $0x50] ss:$8 sps:$4 sm:$0xff]   ;;  %s413_s11 = sshll.u32 %s634_s10, 4  ;;  %s414_s11 = int_to_ptr.vmem [resolvable:$true] %s413_s11 }
  0x3d   :  { %182 = vmatpush1.bf16.msra.mxu0 %v496_v4  ;;  %461 = vmatpush3.bf16.msra.mxu1 %v517_v12  ;;  %v509_v18 = vld [vmem:[#allocation5 + $0x64] ss:$8 sps:$4 sm:$0xff]   ;;  %v521_v19 = vld [vmem:[#allocation7 + $0x10] sm:$0xff]   ;;  %v522_v20 = vld [vmem:[#allocation7 + $0x58] sm:$0xff]   ;;  %v85_v36 = vsub.s32 0, %v84_v35  ;;  %v89_v38 = vsub.s32 1, %v84_v35  ;;  %p603_p11 = scmp.lt.s32.totalorder %s414_s11, %s414_s11 }
  0x3e   :  { %183 = vmatprep.subr.bf16.mxu0 %v497_v5  ;;  %462 = vmatprep.subr.bf16.mxu1 %v518_v14  ;;  %v511_v21 = vld [vmem:[#allocation5 + $0x60] ss:$8 sps:$4 sm:$0xff]   ;;  %v512_v22 = vld [vmem:[#allocation5 + $0x74] ss:$8 sps:$4 sm:$0xff]   ;;  %v514_v25 = vld [vmem:[#allocation5 + $0x70] ss:$8 sps:$4 sm:$0xff]  }
  0x3f   :  { %v523_v23 = vld [vmem:[#allocation7 + $0x18] sm:$0xff]   ;;  %v524_v24 = vld [vmem:[#allocation7 + $0x60] sm:$0xff]   ;;  %v526_v27 = vld [vmem:[#allocation7 + $0x68] sm:$0xff]   ;;  %s598_s12 = scalar_lea.vmem %s414_s11, 256 }
  0x40   :  { %v525_v26 = vld [vmem:[#allocation7 + $0x20] sm:$0xff]   ;;  %v515_v28 = vld [vmem:[#allocation2] sm:$0xff]   ;;  %v527_v29 = vld [vmem:[#allocation7 + $0x28] sm:$0xff]   ;;  %p599_p10 = scmp.ne.s32.totalorder %s414_s11, %s598_s12  ;;  %p604_p12 = scmp.lt.s32.totalorder %s598_s12, %s598_s12 }
  0x41   :  { %184 = vmatpush1.bf16.msra.mxu0 %v499_v6  ;;  %463 = vmatpush3.bf16.msra.mxu1 %v519_v15  ;;  %v528_v30 = vld [vmem:[#allocation7 + $0x70] sm:$0xff]   ;;  %v530_v32 = vld [vmem:[#allocation7 + $0x78] sm:$0xff]  }
  0x42   :  { %185 = vmatprep.subr.bf16.mxu0 %v500_v7  ;;  %464 = vmatprep.subr.bf16.mxu1 %v520_v16  ;;  %v529_v31 = vld [vmem:[#allocation7 + $0x30] sm:$0xff]   ;;  %v531_v33 = vld [vmem:[#allocation7 + $0x38] sm:$0xff]   ;;  %p605_p13 = por %p604_p12, %p603_p11 }
  0x43   :  { %v81_v37 = vld [vmem:[%s727_s2] sm:$0x3] }
  0x44   :  { %v86_v39 = vrot.slane %v81_v37, %v85_v36  ;;  %v90_v40 = vrot.slane %v81_v37, %v89_v38  ;;  %v443_v56 = vld [vmem:[%s729_s4] ss:$0 sm:$0xff]  ;;  %p606_p0 = pnand %p605_p13, %p599_p10 }
  0x45   :  { %186 = vmatpush1.bf16.msra.mxu0 %v502_v8  ;;  %465 = vmatpush3.bf16.msra.mxu1 %v521_v19 }
  0x46   :  { %187 = vmatprep.subr.bf16.mxu0 %v503_v9  ;;  %466 = vmatprep.subr.bf16.mxu1 %v522_v20 }
  0x49   :  { %188 = vmatpush1.bf16.msra.mxu0 %v505_v11  ;;  %467 = vmatpush3.bf16.msra.mxu1 %v523_v23 }
  0x4a   :  { %189 = vmatprep.subr.bf16.mxu0 %v506_v13  ;;  %468 = vmatprep.subr.bf16.mxu1 %v524_v24 }
  0x4d   :  { %190 = vmatpush1.bf16.msra.mxu0 %v508_v17  ;;  %469 = vmatpush3.bf16.msra.mxu1 %v525_v26 }
  0x4e   :  { %191 = vmatprep.subr.bf16.mxu0 %v509_v18  ;;  %470 = vmatprep.subr.bf16.mxu1 %v526_v27 }
  0x51   :  { %192 = vmatpush1.bf16.msra.mxu0 %v511_v21  ;;  %471 = vmatpush3.bf16.msra.mxu1 %v527_v29 }
  0x52   :  { %193 = vmatprep.subr.bf16.mxu0 %v512_v22  ;;  %472 = vmatprep.subr.bf16.mxu1 %v528_v30 }
  0x55   :  { %194 = vmatpush1.bf16.msra.mxu0 %v514_v25  ;;  %473 = vmatpush3.bf16.msra.mxu1 %v529_v31 }
  0x56   :  { %474 = vmatprep.subr.bf16.mxu1 %v530_v32 }
  0x58   :  { %212 = vmatmul.mubr.bf16.vlgmr.msra.gmra.mrb[0].mxu0 %v515_v28 }
  0x59   :  { %475 = vmatpush3.bf16.msra.mxu1 %v531_v33 }
 0x12b   :  { %v213_v41 = vpop.f32.mrb[0].mxu0 }
 0x12c   :  { %v214_v42 = vadd.f32 %v213_v41, %v86_v39  ;;  %v215_v43 = vpop.f32.mrb[1].mxu0 }
 0x12d   :  { %v216_v44 = vadd.f32 %v215_v43, %v90_v40  ;;  %v217_v45 = vpop.f32.mrb[2].mxu0 }
 0x12e   :  { %v218_v46 = vadd.f32 %v217_v45, %v86_v39  ;;  %v219_v47 = vpop.f32.mrb[3].mxu0  ;;  %v222_v49 = vmax.f32 %v214_v42, 0.0 }
 0x12f   :  { %v220_v48 = vadd.f32 %v219_v47, %v90_v40  ;;  %v223_v51 = vmax.f32 %v216_v44, 0.0 }
 0x130   :  { %v224_v50 = vmax.f32 %v218_v46, 0.0 }
 0x131   :  { %v225_v52 = vmax.f32 %v220_v48, 0.0 }
 0x132   :  { %v226_v53 = vpack.c.bf16 %v224_v50, %v222_v49 }
 0x133   :  { %v227_v54 = vpack.c.bf16 %v225_v52, %v223_v51 }
 0x135   :  { %395 = vmatprep.mubr.bf16.mxu1 %v227_v54 }
 0x136   :  { %396 = vmatmul.mubr.bf16.vlgmr.msra.gmra.mrb[0].mxu1 %v226_v53 }
 0x209   :  { %v476_v55 = vpop.f32.mrb[0].mxu1 }
 0x20a   :  { %v477_v57 = vpop.f32.mrb[1].mxu1 }
 0x20b   :  { %v478_v58 = vadd.f32 %v477_v57, %v476_v55  ;;  %v479_v59 = vpop.f32.mrb[2].mxu1 }
 0x20c   :  { %v480_v60 = vpop.f32.mrb[3].mxu1 }
 0x20d   :  { %v398_v61 = vadd.f32 %v478_v58, %v443_v56  ;;  %v481_v62 = vadd.f32 %v480_v60, %v479_v59 }
 0x20f   :  { %v404_v63 = vmax.f32 %v398_v61, 0.0  ;;  %v401_v0 = vadd.f32 %v481_v62, %v443_v56 }
 0x211   :  { %406 = vst [vmem:[#allocation8] sm:$0xff] %v404_v63  ;;  %v405_v1 = vmax.f32 %v401_v0, 0.0 }
 0x213   :  { %407 = vst [vmem:[#allocation8 + $0x8] sm:$0xff] %v405_v1 }
 0x214   :  { %609 = shalt.err (!%p606_p0)
}
 0x215   :  { %s610_s14 = scalar_lea.hbm %s730_s5, 256 }
 0x216   :  { %p611_p1 = scmp.ne.s32.totalorder %s730_s5, %s610_s14  ;;  %p614_p2 = scmp.lt.u32.totalorder %s610_s14, %s730_s5 }
 0x218   :  { %p616_p3 = pnand %p614_p2, %p611_p1 }
 0x21a   :  { %619 = shalt.err (!%p616_p3)
}
 0x21b   :  { %419 = dma.vmem_to_hbm [thread:$0]  %s414_s11, 256, %s730_s5, [#allocation4], %s627_s28, %s627_s28, %s628_s29  }
 0x21c   :  { %624 = dma.done.wait [#allocation4], 256  }
 0x21d   :  { %625 = vsyncadd [#allocation4], 4294967040 }
 0x21e   :  { %423 = vsyncpa [#allocation3], 1 }
 0x21f   :  { %424 = vsyncpa [#allocation6], 1 }
 0x220   :  { %425 = vsyncpa [#allocation4], 1 }

</bundles_post_ra>
